<compile_context>
chip_gen: v6e
topology: v6e:2x2x1
jax: 0.10.0
libtpu: 0.0.40
codegen_flags: <defaults>
</compile_context>

<pallas_src>
import functools

import jax
import jax.numpy as jnp
from jax.experimental import pallas as pl
from jax.experimental.pallas import tpu as pltpu

BN_EPS = 1e-5
# Explicit VMEM budget: fits v7x (64 MiB physical) and v5e/v6e (128 MiB).
VMEM_LIMIT = 48 * 1024 * 1024


def _round_up(x, m):
    return (x + m - 1) // m * m


# ----------------------------------------------------------------------------
# Pallas kernels
# ----------------------------------------------------------------------------
def _conv1x1_kernel(x_ref, w_ref, s_ref, b_ref, o_ref, *, relu):
    """1x1 conv (channel matmul, bf16 MXU) + folded BN + optional ReLU."""
    y = jnp.dot(x_ref[...].astype(jnp.bfloat16),
                w_ref[...].astype(jnp.bfloat16),
                preferred_element_type=jnp.float32)
    y = y * s_ref[...] + b_ref[...]
    if relu:
        y = jnp.maximum(y, 0.0)
    o_ref[...] = y.astype(o_ref.dtype)


def _fpn_level_kernel(x_ref, prev_ref, w1_ref, s1_ref, b1_ref,
                      w3_ref, s3_ref, b3_ref, *rest, H, W, WP, with_seg):
    """One fused FPN level, one batch element per grid step.

    x_ref:    (1, H, W, Cin)        feature at this level
    prev_ref: (1, H/2, W/2, C)      previous (coarser) merged output (bf16)
    w1_ref:   (Cin, C)              lateral 1x1 weight
    s1/b1:    (1, C)                folded BN of lateral conv
    w3_ref:   (9, C, C)             3x3 output-conv weight, taps flattened
    s3/b3:    (1, C)                folded BN of output conv
    [wseg_ref (C, ncls), bseg_ref (1, ncls)]   only on the last level
    o_ref:    (1, H, W, C) bf16   or  (1, H, W, ncls) f32 on the last level
    pad_ref:  VMEM scratch (H+3, WP, C) f32, zero-padded tile (halo = 1)
    """
    if with_seg:
        wseg_ref, bseg_ref, o_ref, pad_ref = rest
    else:
        o_ref, pad_ref = rest

    HP = H + 2
    C_IN = x_ref.shape[-1]
    C = w1_ref.shape[-1]
    H2, W2 = H // 2, W // 2

    # ---- lateral 1x1 conv + folded BN + ReLU (bf16 MXU, f32 epilogue) ----
    xf = x_ref[...].reshape(H * W, C_IN)
    lat = jnp.dot(xf.astype(jnp.bfloat16), w1_ref[...].astype(jnp.bfloat16),
                  preferred_element_type=jnp.float32)
    lat = jnp.maximum(lat * s1_ref[...] + b1_ref[...], 0.0)          # (H*W, C)

    # ---- fused 2x nearest-neighbour upsample of prev level + residual add ----
    prev = prev_ref[...].reshape(H2, W2, C).astype(jnp.float32)
    up = jnp.repeat(jnp.repeat(prev, 2, axis=0), 2, axis=1)          # (H, W, C)
    t = up + lat.reshape(H, W, C)

    # ---- zero-padded copy (halo of 1) in VMEM; width rounded up to 8 sublanes ----
    pad_ref[...] = jnp.zeros_like(pad_ref)
    pad_ref[1:H + 1, 1:W + 1, :] = t
    flat = pad_ref[...].reshape((HP + 1) * WP, C)

    # ---- 3x3 conv: 3 sublane shifts (kw) x 3 cheap row slabs (kh) = 9 matmuls
    #      acc[i*WP + j] = sum_{kh,kw} pad[i+kh, j+kw] @ W3[kh,kw]
    acc = jnp.zeros((H * WP, C), jnp.float32)
    w3b = w3_ref[...].astype(jnp.bfloat16)
    for kw in range(3):
        shifted = flat[kw:kw + HP * WP].reshape(HP, WP, C).astype(jnp.bfloat16)
        for kh in range(3):
            win = shifted[kh:kh + H].reshape(H * WP, C)
            acc += jnp.dot(win, w3b[kh * 3 + kw],
                           preferred_element_type=jnp.float32)
    y = jnp.maximum(acc * s3_ref[...] + b3_ref[...], 0.0)            # (H*WP, C)

    if with_seg:
        # Dropout2d(0.1) is identity in eval mode.
        # TODO(synk): training-mode channel dropout not implemented (inference head).
        z = jnp.dot(y.astype(jnp.bfloat16), wseg_ref[...].astype(jnp.bfloat16),
                    preferred_element_type=jnp.float32) + bseg_ref[...]
        ncls = z.shape[-1]
        z = z.reshape(H, WP, ncls)[:, :W, :]
        o_ref[...] = z.reshape(1, H, W, ncls).astype(o_ref.dtype)
    else:
        yv = y.reshape(H, WP, C)[:, :W, :]
        o_ref[...] = yv.reshape(1, H, W, C).astype(o_ref.dtype)


# ----------------------------------------------------------------------------
# Wrappers (pallas_call plumbing)
# ----------------------------------------------------------------------------
def conv1x1_bn_act(x, w, scale, bias, relu=True, out_dtype=None):
    """x: (N,H,W,Cin) NHWC; w: (Cin,Cout); scale/bias: (Cout,)."""
    n, h, wd, cin = x.shape
    cout = w.shape[1]
    m = n * h * wd
    out_dtype = out_dtype or x.dtype
    # Fixed row tile with ragged tail (masked stores); full extent if unaligned.
    tm = min(m, 512) if m % 8 == 0 else m

    x2 = x.reshape(m, cin)
    s2 = scale.reshape(1, cout).astype(jnp.float32)
    b2 = bias.reshape(1, cout).astype(jnp.float32)

    kernel = functools.partial(_conv1x1_kernel, relu=relu)
    out = pl.pallas_call(
        kernel,
        out_shape=jax.ShapeDtypeStruct((m, cout), out_dtype),
        grid=(pl.cdiv(m, tm),),
        in_specs=[
            pl.BlockSpec((tm, cin), lambda i: (i, 0)),
            pl.BlockSpec((cin, cout), lambda i: (0, 0)),
            pl.BlockSpec((1, cout), lambda i: (0, 0)),
            pl.BlockSpec((1, cout), lambda i: (0, 0)),
        ],
        out_specs=pl.BlockSpec((tm, cout), lambda i: (i, 0)),
        compiler_params=pltpu.CompilerParams(
            dimension_semantics=("parallel",),
            vmem_limit_bytes=VMEM_LIMIT),
    )(x2, w, s2, b2)
    return out.reshape(n, h, wd, cout)


def fpn_level(x, prev, lateral_p, output_p, seg_p=None):
    """Fused: relu(bn(3x3( upsample2x(prev) + relu(bn(1x1(x))) ))) [+ seg 1x1]."""
    w1, s1, b1 = lateral_p
    w3, s3, b3 = output_p
    n, h, w, cin = x.shape
    pn, h2, w2, c = prev.shape
    assert pn == n and h == 2 * h2 and w == 2 * w2, (x.shape, prev.shape)
    assert w1.shape == (cin, c) and w3.shape[:2] == (3, 3)
    cout = w3.shape[-1]
    wp = _round_up(w + 2, 8)

    w3r = w3.reshape(9, c, cout)
    s1r = s1.reshape(1, c).astype(jnp.float32)
    b1r = b1.reshape(1, c).astype(jnp.float32)
    s3r = s3.reshape(1, cout).astype(jnp.float32)
    b3r = b3.reshape(1, cout).astype(jnp.float32)

    with_seg = seg_p is not None
    args = [x, prev, w1, s1r, b1r, w3r, s3r, b3r]
    in_specs = [
        pl.BlockSpec((1, h, w, cin), lambda b: (b, 0, 0, 0)),
        pl.BlockSpec((1, h2, w2, c), lambda b: (b, 0, 0, 0)),
        pl.BlockSpec((cin, c), lambda b: (0, 0)),
        pl.BlockSpec((1, c), lambda b: (0, 0)),
        pl.BlockSpec((1, c), lambda b: (0, 0)),
        pl.BlockSpec((9, c, cout), lambda b: (0, 0, 0)),
        pl.BlockSpec((1, cout), lambda b: (0, 0)),
        pl.BlockSpec((1, cout), lambda b: (0, 0)),
    ]
    if with_seg:
        wseg, bseg = seg_p
        ncls = wseg.shape[1]
        args += [wseg, bseg.reshape(1, ncls).astype(jnp.float32)]
        in_specs += [pl.BlockSpec((cout, ncls), lambda b: (0, 0)),
                     pl.BlockSpec((1, ncls), lambda b: (0, 0))]
        out_c, out_dtype = ncls, jnp.float32
    else:
        out_c, out_dtype = cout, jnp.bfloat16   # inter-level activations in bf16

    kernel = functools.partial(_fpn_level_kernel, H=h, W=w, WP=wp,
                               with_seg=with_seg)
    return pl.pallas_call(
        kernel,
        out_shape=jax.ShapeDtypeStruct((n, h, w, out_c), out_dtype),
        grid=(n,),
        in_specs=in_specs,
        out_specs=pl.BlockSpec((1, h, w, out_c), lambda b: (b, 0, 0, 0)),
        scratch_shapes=[pltpu.VMEM((h + 3, wp, c), jnp.float32)],
        compiler_params=pltpu.CompilerParams(
            dimension_semantics=("parallel",),
            vmem_limit_bytes=VMEM_LIMIT),
    )(*args)


# ----------------------------------------------------------------------------
# Parameter construction (deterministic, mirrors FPNHead.__init__ shapes)
# ----------------------------------------------------------------------------
def _folded_bn(key, c):
    k1, k2, k3, k4 = jax.random.split(key, 4)
    gamma = jax.random.uniform(k1, (c,), jnp.float32, 0.5, 1.5)
    beta = jax.random.normal(k2, (c,), jnp.float32) * 0.1
    mean = jax.random.normal(k3, (c,), jnp.float32) * 0.1
    var = jax.random.uniform(k4, (c,), jnp.float32, 0.5, 1.5)
    scale = gamma / jnp.sqrt(var + BN_EPS)
    bias = beta - mean * scale
    return scale, bias


def init_params(key, in_channels, channel, num_classes):
    params = {"lateral": [], "output": []}
    for ch in in_channels[::-1]:
        key, kw, kb = jax.random.split(key, 3)
        w1 = jax.random.normal(kw, (ch, channel), jnp.float32) / jnp.sqrt(ch)
        params["lateral"].append((w1,) + _folded_bn(kb, channel))

        key, kw, kb = jax.random.split(key, 3)
        w3 = jax.random.normal(kw, (3, 3, channel, channel), jnp.float32) / jnp.sqrt(9 * channel)
        params["output"].append((w3,) + _folded_bn(kb, channel))

    key, kw, kb = jax.random.split(key, 3)
    w_seg = jax.random.normal(kw, (channel, num_classes), jnp.float32) / jnp.sqrt(channel)
    b_seg = jax.random.normal(kb, (num_classes,), jnp.float32) * 0.1
    params["seg"] = (w_seg, b_seg)
    return params


# ----------------------------------------------------------------------------
# FPNHead forward (Pallas path)
# ----------------------------------------------------------------------------
def fpn_head_forward(features, params):
    """features: list of NHWC arrays ordered high-res -> low-res (like PyTorch input)."""
    feats = features[::-1]
    num = len(feats)
    w, s, b = params["lateral"][0]
    out = conv1x1_bn_act(feats[0], w, s, b, relu=True, out_dtype=jnp.bfloat16)
    for i in range(1, num):
        seg = params["seg"] if i == num - 1 else None
        out = fpn_level(feats[i], out, params["lateral"][i],
                        params["output"][i], seg_p=seg)
    if num == 1:  # degenerate single-level head: seg conv applied directly
        w_seg, b_seg = params["seg"]
        out = conv1x1_bn_act(out, w_seg, jnp.ones_like(b_seg), b_seg,
                             relu=False, out_dtype=jnp.float32)
    return out


# ----------------------------------------------------------------------------
# Pure-JAX reference (mirrors the kernel's bf16-matmul / f32-epilogue numerics)
# ----------------------------------------------------------------------------
def fpn_head_reference(features, params):
    bf16, f32 = jnp.bfloat16, jnp.float32

    def c1(x, w, s, b, relu):
        cin = x.shape[-1]
        y = jnp.dot(x.reshape(-1, cin).astype(bf16), w.astype(bf16),
                    preferred_element_type=f32)
        y = y.reshape(x.shape[:-1] + (w.shape[1],)) * s + b
        return jnp.maximum(y, 0.0) if relu else y

    def c3(x, w, s, b):
        y = jax.lax.conv_general_dilated(
            x.astype(bf16), w.astype(bf16), (1, 1), 'SAME',
            dimension_numbers=('NHWC', 'HWIO', 'NHWC'),
            preferred_element_type=f32)
        return jnp.maximum(y * s + b, 0.0)

    feats = features[::-1]
    num = len(feats)
    w, s, b = params["lateral"][0]
    out = c1(feats[0], w, s, b, True).astype(bf16)   # level-0 kernel stores bf16
    for i in range(1, num):
        up = jnp.repeat(jnp.repeat(out.astype(f32), 2, 1), 2, 2)
        w, s, b = params["lateral"][i]
        t = up + c1(feats[i], w, s, b, True)
        w3, s3, b3 = params["output"][i]
        y = c3(t, w3, s3, b3)
        if i < num - 1:
            out = y.astype(bf16)                     # inter-level HBM tensors are bf16
        else:
            w_seg, b_seg = params["seg"]
            out = c1(y, w_seg, jnp.ones_like(b_seg), b_seg, False)
    if num == 1:
        w_seg, b_seg = params["seg"]
        out = c1(out.astype(f32), w_seg, jnp.ones_like(b_seg), b_seg, False)
    return out


# ----------------------------------------------------------------------------
if __name__ == "__main__":
    in_channels = [16, 32, 64]
    channel = 32
    num_classes = 3
    N = 2
    # Feature pyramid (NHWC), high-res first: strides 1x, 2x, 4x.
    shapes = [(N, 16, 16, 16), (N, 8, 8, 32), (N, 4, 4, 64)]

    key = jax.random.PRNGKey(0)
    key, *fkeys = jax.random.split(key, len(shapes) + 1)
    features = [jax.random.normal(k, s, jnp.float32) for k, s in zip(fkeys, shapes)]

    params = init_params(jax.random.PRNGKey(42), in_channels, channel, num_classes)

    out = jax.block_until_ready(fpn_head_forward(features, params))
    assert out.shape == (N, 16, 16, num_classes), out.shape
    assert out.dtype == jnp.float32, out.dtype

    ref = jax.block_until_ready(fpn_head_reference(features, params))
    max_diff = float(jnp.max(jnp.abs(out - ref)))
    if not jnp.allclose(out, ref, rtol=5e-2, atol=5e-2):
        raise RuntimeError(f"Pallas output mismatch vs reference, max_diff={max_diff}")

    print("KERNEL_OK")
</pallas_src>

<mosaic_0001>
module attributes {stable_mosaic.version = 11 : i64} {
  func.func @_conv1x1_kernel(%arg0: i32, %arg1: memref<32x64xf32, #tpu.memory_space<vmem>>, %arg2: memref<64x32xf32, #tpu.memory_space<vmem>>, %arg3: memref<1x32xf32, #tpu.memory_space<vmem>>, %arg4: memref<1x32xf32, #tpu.memory_space<vmem>>, %arg5: memref<32x32xbf16, #tpu.memory_space<vmem>>) attributes {dimension_semantics = [#tpu.dimension_semantics<parallel>], iteration_bounds = array<i64: 1>, scalar_prefetch = 0 : i64, scratch_operands = 0 : i64, tpu.core_type = #tpu.core_type<tc>, window_params = [{transform_indices = @transform_0, window_bounds = array<i64: 32, 64>}, {pipeline_mode = #tpu.pipeline_mode<synchronous>, transform_indices = @transform_1, window_bounds = array<i64: 64, 32>}, {pipeline_mode = #tpu.pipeline_mode<synchronous>, transform_indices = @transform_2, window_bounds = array<i64: 1, 32>}, {pipeline_mode = #tpu.pipeline_mode<synchronous>, transform_indices = @transform_3, window_bounds = array<i64: 1, 32>}, {transform_indices = @transform_4, window_bounds = array<i64: 32, 32>}]} {
    %c0 = arith.constant 0 : index
    %c0_0 = arith.constant 0 : index
    %0 = vector.load %arg1[%c0, %c0_0] : memref<32x64xf32, #tpu.memory_space<vmem>>, vector<32x64xf32>
    %1 = arith.truncf %0 : vector<32x64xf32> to vector<32x64xbf16>
    %c0_1 = arith.constant 0 : index
    %c0_2 = arith.constant 0 : index
    %2 = vector.load %arg2[%c0_1, %c0_2] : memref<64x32xf32, #tpu.memory_space<vmem>>, vector<64x32xf32>
    %3 = arith.truncf %2 : vector<64x32xf32> to vector<64x32xbf16>
    %cst = arith.constant dense<0.000000e+00> : vector<32x32xf32>
    %4 = tpu.matmul %1, %3, %cst {dimension_numbers = #tpu.dot_dimension_numbers<[1], [0], [0], [1], [0, 0, 1, 1], [], []>} : vector<32x64xbf16>, vector<64x32xbf16>, vector<32x32xf32> -> vector<32x32xf32>
    %c0_3 = arith.constant 0 : index
    %c0_4 = arith.constant 0 : index
    %5 = vector.load %arg3[%c0_3, %c0_4] : memref<1x32xf32, #tpu.memory_space<vmem>>, vector<1x32xf32>
    %6 = vector.broadcast %5 : vector<1x32xf32> to vector<32x32xf32>
    %7 = arith.mulf %4, %6 : vector<32x32xf32>
    %c0_5 = arith.constant 0 : index
    %c0_6 = arith.constant 0 : index
    %8 = vector.load %arg4[%c0_5, %c0_6] : memref<1x32xf32, #tpu.memory_space<vmem>>, vector<1x32xf32>
    %9 = vector.broadcast %8 : vector<1x32xf32> to vector<32x32xf32>
    %10 = arith.addf %7, %9 : vector<32x32xf32>
    %cst_7 = arith.constant 0.000000e+00 : f32
    %11 = vector.broadcast %cst_7 : f32 to vector<32x32xf32>
    %12 = arith.maximumf %10, %11 : vector<32x32xf32>
    %13 = arith.truncf %12 : vector<32x32xf32> to vector<32x32xbf16>
    %c0_8 = arith.constant 0 : index
    %c0_9 = arith.constant 0 : index
    %14 = vector.load %arg5[%c0_8, %c0_9] : memref<32x32xbf16, #tpu.memory_space<vmem>>, vector<32x32xbf16>
    tpu.vector_store %arg5[%c0_8, %c0_9], %13 {strides = array<i32>} : memref<32x32xbf16, #tpu.memory_space<vmem>>, vector<32x32xbf16>,
    return
  }
  func.func @transform_0(%arg0: i32) -> (i32, i32) {
    %c0_i32 = arith.constant 0 : i32
    %c0_i32_0 = arith.constant 0 : i32
    return %arg0, %c0_i32 : i32, i32
  }
  func.func @transform_1(%arg0: i32) -> (i32, i32) {
    %c0_i32 = arith.constant 0 : i32
    %c0_i32_0 = arith.constant 0 : i32
    %c0_i32_1 = arith.constant 0 : i32
    return %c0_i32, %c0_i32_0 : i32, i32
  }
  func.func @transform_2(%arg0: i32) -> (i32, i32) {
    %c0_i32 = arith.constant 0 : i32
    %c0_i32_0 = arith.constant 0 : i32
    %c0_i32_1 = arith.constant 0 : i32
    return %c0_i32, %c0_i32_0 : i32, i32
  }
  func.func @transform_3(%arg0: i32) -> (i32, i32) {
    %c0_i32 = arith.constant 0 : i32
    %c0_i32_0 = arith.constant 0 : i32
    %c0_i32_1 = arith.constant 0 : i32
    return %c0_i32, %c0_i32_0 : i32, i32
  }
  func.func @transform_4(%arg0: i32) -> (i32, i32) {
    %c0_i32 = arith.constant 0 : i32
    %c0_i32_0 = arith.constant 0 : i32
    return %arg0, %c0_i32 : i32, i32
  }
}

</mosaic_0001>

<bundles_post_ra>
// kernel: tpu_custom_call.1
= control target key start
LH: loop header
LB: loop body
LE: loop exit
PB: predicated region body
PF: predicated region fallthrough
CT: control target
= control target key end

     0   :  { %vm37_vm0 = vcmask 523264   ;;  %s290_s0 = inlined_call_operand.vmem [shape: f32[32,64], index: 0, kind: input, shape index: {}]   ;;  %s291_s1 = inlined_call_operand.vmem [shape: f32[64,32], index: 1, kind: input, shape index: {}]   ;;  %s292_s2 = inlined_call_operand.vmem [shape: f32[1,32], index: 2, kind: input, shape index: {}]   ;;  %s293_s3 = inlined_call_operand.vmem [shape: f32[1,32], index: 3, kind: input, shape index: {}]   ;;  %s294_s4 = inlined_call_operand.hbm [shape: bf16[32,32], index: 4, kind: output, shape index: {}]  }
   0x1   :  { %v31_v0 = vld [vmem:[%s291_s1 + $0x30] sm:$0xff]  ;;  %v32_v1 = vld [vmem:[%s291_s1 + $0x38] sm:$0xff]  ;;  %v29_v2 = vld [vmem:[%s291_s1 + $0x20] sm:$0xff] }
   0x2   :  { %v36_v3 = vpack.c.bf16 %v32_v1, %v31_v0  ;;  %v30_v4 = vld [vmem:[%s291_s1 + $0x28] sm:$0xff]  ;;  %v27_v6 = vld [vmem:[%s291_s1 + $0x10] sm:$0xff]  ;;  %v28_v7 = vld [vmem:[%s291_s1 + $0x18] sm:$0xff] }
   0x3   :  { %v35_v5 = vpack.c.bf16 %v30_v4, %v29_v2  ;;  %v19_v8 = vld [vmem:[%s290_s0] sm:$0xff]  ;;  %v20_v9 = vld [vmem:[%s290_s0 + $0x8] sm:$0xff] }
   0x4   :  { %174 = vmatprep.subr.bf16.mxu0 %v36_v3  ;;  %v23_v10 = vpack.c.bf16 %v20_v9, %v19_v8 }
   0x5   :  { %175 = vmatpush3.bf16.msra.mxu0 %v36_v3 }
   0x6   :  { %9 = vsyncpa [#allocation3], 0  ;;  %176 = vmatprep.subr.bf16.mxu0 %v35_v5  ;;  %v34_v11 = vpack.c.bf16 %v28_v7, %v27_v6  ;;  %v25_v12 = vld [vmem:[%s291_s1] sm:$0xff]  ;;  %v26_v13 = vld [vmem:[%s291_s1 + $0x8] sm:$0xff]  ;;  %182 = vmatprep.mubr.msk.bf16.mxu0 %vm37_vm0, %v23_v10  ;;  %vm135_vm1 = vcmask 257024  }
   0x7   :  { %v33_v14 = vpack.c.bf16 %v26_v13, %v25_v12  ;;  %v21_v15 = vld [vmem:[%s290_s0 + $0x10] sm:$0xff]  ;;  %v22_v16 = vld [vmem:[%s290_s0 + $0x18] sm:$0xff]  ;;  %v158_v18 = vld [vmem:[%s292_s2] ss:$0 sm:$0xff]  ;;  %s211_s0 = smov [#allocation2]  }
   0x8   :  { %v24_v17 = vpack.c.bf16 %v22_v16, %v21_v15  ;;  %v159_v20 = vld [vmem:[%s293_s3] ss:$0 sm:$0xff]  ;;  %s145_s2 = sshll.u32 %s211_s0, 4  ;;  %s146_s2 = int_to_ptr.vmem [resolvable:$true] %s145_s2 }
   0x9   :  { %177 = vmatpush3.bf16.msra.mxu0 %v35_v5  ;;  %s189_s3 = scalar_lea.vmem %s146_s2, 256  ;;  %p194_p1 = scmp.lt.s32.totalorder %s146_s2, %s146_s2 }
   0xa   :  { %178 = vmatprep.subr.bf16.mxu0 %v34_v11  ;;  %p190_p0 = scmp.ne.s32.totalorder %s146_s2, %s189_s3  ;;  %p195_p2 = scmp.lt.s32.totalorder %s189_s3, %s189_s3 }
   0xc   :  { %p196_p3 = por %p195_p2, %p194_p1 }
   0xd   :  { %179 = vmatpush3.bf16.msra.mxu0 %v34_v11 }
   0xe   :  { %180 = vmatprep.subr.bf16.mxu0 %v33_v14  ;;  %p197_p4 = pnand %p196_p3, %p190_p0 }
  0x11   :  { %181 = vmatpush3.bf16.msra.mxu0 %v33_v14 }
  0x14   :  { %183 = vmatmul.mubr.msk.bf16.vlgmr.msra.gmra.mxu0 %vm37_vm0, %v24_v17 }
  0xd4   :  { %v184_v19 = vpop.f32.mrf.mxu0 }
  0xd5   :  { %v102_v21 = vmul.f32 %v184_v19, %v158_v18 }
  0xd6   :  { %v78_v22 = vpop.f32.mrf.mxu0 }
  0xd7   :  { %v113_v23 = vadd.f32 %v159_v20, %v102_v21  ;;  %v100_v24 = vmul.f32 %v158_v18, %v78_v22 }
  0xd8   :  { %v185_v25 = vpop.f32.mrf.mxu0 }
  0xd9   :  { %v117_v26 = vmax.f32 %v113_v23, 0.0  ;;  %v111_v27 = vadd.f32 %v159_v20, %v100_v24  ;;  %v103_v28 = vmul.f32 %v185_v25, %v158_v18 }
  0xda   :  { %v81_v29 = vpop.f32.mrf.mxu0 }
  0xdb   :  { %v166_v30 = vpack.c.bf16 %v117_v26, %v117_v26  ;;  %v115_v31 = vmax.f32 %v111_v27, 0.0  ;;  %v114_v32 = vadd.f32 %v159_v20, %v103_v28  ;;  %v101_v33 = vmul.f32 %v158_v18, %v81_v29 }
  0xdd   :  { %138 = vst.msk [vmem:[#allocation2 + $0x8] sm:$0xf] %vm135_vm1, %v166_v30  ;;  %v164_v34 = vpack.c.bf16 %v115_v31, %v115_v31  ;;  %v118_v35 = vmax.f32 %v114_v32, 0.0  ;;  %v112_v36 = vadd.f32 %v159_v20, %v101_v33 }
  0xdf   :  { %136 = vst.msk [vmem:[#allocation2] sm:$0xf] %vm135_vm1, %v164_v34  ;;  %v167_v37 = vpack.c.bf16 %v118_v35, %v118_v35  ;;  %v116_v38 = vmax.f32 %v112_v36, 0.0 }
  0xe1   :  { %139 = vst.msk [vmem:[#allocation2 + $0xc] sm:$0xf] %vm135_vm1, %v167_v37  ;;  %v165_v39 = vpack.c.bf16 %v116_v38, %v116_v38 }
  0xe3   :  { %137 = vst.msk [vmem:[#allocation2 + $0x4] sm:$0xf] %vm135_vm1, %v165_v39 }
  0xe4   :  { %200 = shalt.err (!%p197_p4)
}
  0xe5   :  { %s212_s16 = smov 64   ;;  %s213_s17 = smov 4  }
  0xe6   :  { %151 = dma.vmem_to_hbm [thread:$0]  %s146_s2, 256, %s294_s4, [#allocation3], %s212_s16, %s212_s16, %s213_s17  }
  0xe7   :  { %209 = dma.done.wait [#allocation3], 256  }
  0xe8   :  { %210 = vsyncadd [#allocation3], 4294967040 }
  0xe9   :  { %155 = vsyncpa [#allocation3], 1 }

</bundles_post_ra>
